<compile_context>
chip_gen: v5e
topology: v5e:2x2
jax: 0.10.0
libtpu: 0.0.40
codegen_flags: <defaults>
</compile_context>

<pallas_src>
import jax
import jax.numpy as jnp
import numpy as np
from jax.experimental import pallas as pl
from jax.experimental.pallas import tpu as pltpu

HIDDEN = 64


def _round_up(x, m):
    return ((x + m - 1) // m) * m


# ----------------------------------------------------------------------------
# Pallas kernel: one batch tile through the whole fused MLP.
# ----------------------------------------------------------------------------
def actor_critic_kernel(
    obs_ref,
    w1_ref, b1_ref, w2_ref, b2_ref,      # features_extractor (in, out) layout
    wh1_ref, bh1_ref,                    # fused [policy|value] first layers
    wh2_ref, bh2_ref,                    # fused block-diag second layers
    out_ref,                             # packed [action_mean | value]
):
    x = obs_ref[...]                                                  # (TB, obs_dim)

    # features_extractor: Linear -> Tanh -> Linear -> Tanh
    h = jnp.tanh(
        jnp.dot(x, w1_ref[...], preferred_element_type=jnp.float32) + b1_ref[...]
    )
    feat = jnp.tanh(
        jnp.dot(h, w2_ref[...], preferred_element_type=jnp.float32) + b2_ref[...]
    )

    # fused heads, first layer: tanh(feat @ [Wp1 | Wv1] + [bp1 | bv1])  -> (TB, 128)
    pv = jnp.tanh(
        jnp.dot(feat, wh1_ref[...], preferred_element_type=jnp.float32) + bh1_ref[...]
    )

    # fused heads, second layer (block-diagonal weight): one matmul gives
    # [action_mean | value] packed along the lane axis -> (TB, action_dim + 1)
    out_ref[...] = (
        jnp.dot(pv, wh2_ref[...], preferred_element_type=jnp.float32) + bh2_ref[...]
    )


# ----------------------------------------------------------------------------
# Wrapper: builds fused weights, grids over the batch, splits packed output.
# ----------------------------------------------------------------------------
def actor_critic_forward(obs, params, tile_b=512):
    """Returns (action_mean, action_std, value) with value already squeezed."""
    B, obs_dim = obs.shape
    action_dim = params["wp2"].shape[1]
    out_w = action_dim + 1

    # --- fuse the two heads -------------------------------------------------
    wh1 = jnp.concatenate([params["wp1"], params["wv1"]], axis=1)      # (64, 128)
    bh1 = jnp.concatenate([params["bp1"], params["bv1"]], axis=1)      # (1, 128)
    wh2 = jnp.zeros((2 * HIDDEN, out_w), jnp.float32)
    wh2 = wh2.at[:HIDDEN, :action_dim].set(params["wp2"])              # policy block
    wh2 = wh2.at[HIDDEN:, action_dim:].set(params["wv2"])              # value block
    bh2 = jnp.concatenate([params["bp2"], params["bv2"]], axis=1)      # (1, out_w)

    # --- batch tiling (TB multiple of 8; pad B up to a multiple of TB) ------
    TB = min(tile_b, _round_up(B, 8))
    B_pad = _round_up(B, TB)
    if B_pad != B:
        obs_p = jnp.zeros((B_pad, obs_dim), obs.dtype).at[:B].set(obs)
    else:
        obs_p = obs
    grid = (B_pad // TB,)

    const = lambda i: (0, 0)        # weights/biases resident across the grid
    stream = lambda i: (i, 0)       # activations stream tile-by-tile

    packed = pl.pallas_call(
        actor_critic_kernel,
        out_shape=jax.ShapeDtypeStruct((B_pad, out_w), jnp.float32),
        grid_spec=pltpu.PrefetchScalarGridSpec(
            num_scalar_prefetch=0,
            grid=grid,
            in_specs=[
                pl.BlockSpec((TB, obs_dim), stream),
                pl.BlockSpec((obs_dim, HIDDEN), const),
                pl.BlockSpec((1, HIDDEN), const),
                pl.BlockSpec((HIDDEN, HIDDEN), const),
                pl.BlockSpec((1, HIDDEN), const),
                pl.BlockSpec((HIDDEN, 2 * HIDDEN), const),
                pl.BlockSpec((1, 2 * HIDDEN), const),
                pl.BlockSpec((2 * HIDDEN, out_w), const),
                pl.BlockSpec((1, out_w), const),
            ],
            out_specs=pl.BlockSpec((TB, out_w), stream),
        ),
        compiler_params=pltpu.CompilerParams(
            dimension_semantics=("parallel",),   # shard batch axis over v7x TCs
        ),
    )(
        obs_p,
        params["w1"], params["b1"], params["w2"], params["b2"],
        wh1, bh1, wh2, bh2,
    )

    packed = packed[:B]
    mean = packed[:, :action_dim]
    value = packed[:, action_dim]
    # std depends only on a (1, action_dim) parameter -> compute outside kernel
    std = jnp.broadcast_to(jnp.exp(params["log_std"]), mean.shape)
    return mean, std, value


# ----------------------------------------------------------------------------
# Deterministic parameter init (orthogonal, matching the module's _init_weights)
# ----------------------------------------------------------------------------
def orthogonal_init(key, out_dim, in_dim, gain):
    """Orthogonal init like nn.init.orthogonal_ (weight shape (out, in))."""
    rows, cols = out_dim, in_dim
    flat = jax.random.normal(key, (rows, cols), dtype=jnp.float32)
    if rows < cols:
        flat = flat.T
    q, r = jnp.linalg.qr(flat)
    d = jnp.sign(jnp.diag(r))
    q = q * d[None, :]
    if rows < cols:
        q = q.T
    return (gain * q).astype(jnp.float32)


def make_params(key, obs_dim, action_dim):
    keys = jax.random.split(key, 6)
    g = float(np.sqrt(2.0))

    def linear(k, in_dim, out_dim, gain):
        w = orthogonal_init(k, out_dim, in_dim, gain)   # PyTorch layout (out, in)
        b = jnp.zeros((1, out_dim), dtype=jnp.float32)
        return w.T, b                                   # kernel layout (in, out)

    w1, b1 = linear(keys[0], obs_dim, HIDDEN, g)
    w2, b2 = linear(keys[1], HIDDEN, HIDDEN, g)
    wp1, bp1 = linear(keys[2], HIDDEN, HIDDEN, g)
    wp2, bp2 = linear(keys[3], HIDDEN, action_dim, 0.01)
    wv1, bv1 = linear(keys[4], HIDDEN, HIDDEN, g)
    wv2, bv2 = linear(keys[5], HIDDEN, 1, 1.0)
    log_std = jnp.zeros((1, action_dim), dtype=jnp.float32)

    return dict(
        w1=w1, b1=b1, w2=w2, b2=b2,
        wp1=wp1, bp1=bp1, wp2=wp2, bp2=bp2,
        wv1=wv1, bv1=bv1, wv2=wv2, bv2=bv2,
        log_std=log_std,
    )


# ----------------------------------------------------------------------------
# Pure-JAX reference (unfused) for verification
# ----------------------------------------------------------------------------
def reference_forward(obs, p):
    h = jnp.tanh(obs @ p["w1"] + p["b1"])
    feat = jnp.tanh(h @ p["w2"] + p["b2"])
    mean = jnp.tanh(feat @ p["wp1"] + p["bp1"]) @ p["wp2"] + p["bp2"]
    value = (jnp.tanh(feat @ p["wv1"] + p["bv1"]) @ p["wv2"] + p["bv2"])[:, 0]
    std = jnp.broadcast_to(jnp.exp(p["log_std"]), mean.shape)
    return mean, std, value


if __name__ == "__main__":
    key = jax.random.PRNGKey(0)
    k_obs, k_obs2, k_params = jax.random.split(key, 3)

    OBS_DIM, ACTION_DIM = 4, 2          # small continuous-control env
    params = make_params(k_params, OBS_DIM, ACTION_DIM)

    # --- small batch (single tile) ------------------------------------------
    B = 8
    obs = jax.random.normal(k_obs, (B, OBS_DIM), dtype=jnp.float32)
    mean, std, value = actor_critic_forward(obs, params)
    jax.block_until_ready((mean, std, value))

    ref_mean, ref_std, ref_value = reference_forward(obs, params)
    np.testing.assert_allclose(np.asarray(mean), np.asarray(ref_mean), atol=1e-5, rtol=1e-5)
    np.testing.assert_allclose(np.asarray(std), np.asarray(ref_std), atol=1e-5, rtol=1e-5)
    np.testing.assert_allclose(np.asarray(value), np.asarray(ref_value), atol=1e-5, rtol=1e-5)
    assert mean.shape == (B, ACTION_DIM)
    assert std.shape == (B, ACTION_DIM)
    assert value.shape == (B,)

    # --- larger batch: exercises padding + multi-step grid -------------------
    B2 = 1000                            # pads to 1024, grid=(2,) with TB=512
    obs2 = jax.random.normal(k_obs2, (B2, OBS_DIM), dtype=jnp.float32)
    mean2, std2, value2 = actor_critic_forward(obs2, params)
    jax.block_until_ready((mean2, std2, value2))

    ref_mean2, ref_std2, ref_value2 = reference_forward(obs2, params)
    np.testing.assert_allclose(np.asarray(mean2), np.asarray(ref_mean2), atol=1e-5, rtol=1e-5)
    np.testing.assert_allclose(np.asarray(std2), np.asarray(ref_std2), atol=1e-5, rtol=1e-5)
    np.testing.assert_allclose(np.asarray(value2), np.asarray(ref_value2), atol=1e-5, rtol=1e-5)
    assert mean2.shape == (B2, ACTION_DIM)
    assert value2.shape == (B2,)

    print("KERNEL_OK")
</pallas_src>

<mosaic_0001>
module attributes {stable_mosaic.version = 11 : i64} {
  func.func @actor_critic_kernel(%arg0: i32, %arg1: memref<8x4xf32, #tpu.memory_space<vmem>>, %arg2: memref<4x64xf32, #tpu.memory_space<vmem>>, %arg3: memref<1x64xf32, #tpu.memory_space<vmem>>, %arg4: memref<64x64xf32, #tpu.memory_space<vmem>>, %arg5: memref<1x64xf32, #tpu.memory_space<vmem>>, %arg6: memref<64x128xf32, #tpu.memory_space<vmem>>, %arg7: memref<1x128xf32, #tpu.memory_space<vmem>>, %arg8: memref<128x3xf32, #tpu.memory_space<vmem>>, %arg9: memref<1x3xf32, #tpu.memory_space<vmem>>, %arg10: memref<8x3xf32, #tpu.memory_space<vmem>>) attributes {dimension_semantics = [#tpu.dimension_semantics<parallel>], iteration_bounds = array<i64: 1>, scalar_prefetch = 0 : i64, scratch_operands = 0 : i64, tpu.core_type = #tpu.core_type<tc>, window_params = [{transform_indices = @transform_0, window_bounds = array<i64: 8, 4>}, {pipeline_mode = #tpu.pipeline_mode<synchronous>, transform_indices = @transform_1, window_bounds = array<i64: 4, 64>}, {pipeline_mode = #tpu.pipeline_mode<synchronous>, transform_indices = @transform_2, window_bounds = array<i64: 1, 64>}, {pipeline_mode = #tpu.pipeline_mode<synchronous>, transform_indices = @transform_3, window_bounds = array<i64: 64, 64>}, {pipeline_mode = #tpu.pipeline_mode<synchronous>, transform_indices = @transform_4, window_bounds = array<i64: 1, 64>}, {pipeline_mode = #tpu.pipeline_mode<synchronous>, transform_indices = @transform_5, window_bounds = array<i64: 64, 128>}, {pipeline_mode = #tpu.pipeline_mode<synchronous>, transform_indices = @transform_6, window_bounds = array<i64: 1, 128>}, {pipeline_mode = #tpu.pipeline_mode<synchronous>, transform_indices = @transform_7, window_bounds = array<i64: 128, 3>}, {pipeline_mode = #tpu.pipeline_mode<synchronous>, transform_indices = @transform_8, window_bounds = array<i64: 1, 3>}, {transform_indices = @transform_9, window_bounds = array<i64: 8, 3>}]} {
    %c0 = arith.constant 0 : index
    %c0_0 = arith.constant 0 : index
    %0 = vector.load %arg1[%c0, %c0_0] : memref<8x4xf32, #tpu.memory_space<vmem>>, vector<8x4xf32>
    %c0_1 = arith.constant 0 : index
    %c0_2 = arith.constant 0 : index
    %1 = vector.load %arg2[%c0_1, %c0_2] : memref<4x64xf32, #tpu.memory_space<vmem>>, vector<4x64xf32>
    %cst = arith.constant dense<0.000000e+00> : vector<8x64xf32>
    %2 = tpu.matmul %0, %1, %cst {dimension_numbers = #tpu.dot_dimension_numbers<[1], [0], [0], [1], [0, 0, 1, 1], [], []>} : vector<8x4xf32>, vector<4x64xf32>, vector<8x64xf32> -> vector<8x64xf32>
    %c0_3 = arith.constant 0 : index
    %c0_4 = arith.constant 0 : index
    %3 = vector.load %arg3[%c0_3, %c0_4] : memref<1x64xf32, #tpu.memory_space<vmem>>, vector<1x64xf32>
    %4 = vector.broadcast %3 : vector<1x64xf32> to vector<8x64xf32>
    %5 = arith.addf %2, %4 : vector<8x64xf32>
    %6 = math.tanh %5 : vector<8x64xf32>
    %c0_5 = arith.constant 0 : index
    %c0_6 = arith.constant 0 : index
    %7 = vector.load %arg4[%c0_5, %c0_6] : memref<64x64xf32, #tpu.memory_space<vmem>>, vector<64x64xf32>
    %cst_7 = arith.constant dense<0.000000e+00> : vector<8x64xf32>
    %8 = tpu.matmul %6, %7, %cst_7 {dimension_numbers = #tpu.dot_dimension_numbers<[1], [0], [0], [1], [0, 0, 1, 1], [], []>} : vector<8x64xf32>, vector<64x64xf32>, vector<8x64xf32> -> vector<8x64xf32>
    %c0_8 = arith.constant 0 : index
    %c0_9 = arith.constant 0 : index
    %9 = vector.load %arg5[%c0_8, %c0_9] : memref<1x64xf32, #tpu.memory_space<vmem>>, vector<1x64xf32>
    %10 = vector.broadcast %9 : vector<1x64xf32> to vector<8x64xf32>
    %11 = arith.addf %8, %10 : vector<8x64xf32>
    %12 = math.tanh %11 : vector<8x64xf32>
    %c0_10 = arith.constant 0 : index
    %c0_11 = arith.constant 0 : index
    %13 = vector.load %arg6[%c0_10, %c0_11] : memref<64x128xf32, #tpu.memory_space<vmem>>, vector<64x128xf32>
    %cst_12 = arith.constant dense<0.000000e+00> : vector<8x128xf32>
    %14 = tpu.matmul %12, %13, %cst_12 {dimension_numbers = #tpu.dot_dimension_numbers<[1], [0], [0], [1], [0, 0, 1, 1], [], []>} : vector<8x64xf32>, vector<64x128xf32>, vector<8x128xf32> -> vector<8x128xf32>
    %c0_13 = arith.constant 0 : index
    %c0_14 = arith.constant 0 : index
    %15 = vector.load %arg7[%c0_13, %c0_14] : memref<1x128xf32, #tpu.memory_space<vmem>>, vector<1x128xf32>
    %16 = vector.broadcast %15 : vector<1x128xf32> to vector<8x128xf32>
    %17 = arith.addf %14, %16 : vector<8x128xf32>
    %18 = math.tanh %17 : vector<8x128xf32>
    %c0_15 = arith.constant 0 : index
    %c0_16 = arith.constant 0 : index
    %19 = vector.load %arg8[%c0_15, %c0_16] : memref<128x3xf32, #tpu.memory_space<vmem>>, vector<128x3xf32>
    %cst_17 = arith.constant dense<0.000000e+00> : vector<8x3xf32>
    %20 = tpu.matmul %18, %19, %cst_17 {dimension_numbers = #tpu.dot_dimension_numbers<[1], [0], [0], [1], [0, 0, 1, 1], [], []>} : vector<8x128xf32>, vector<128x3xf32>, vector<8x3xf32> -> vector<8x3xf32>
    %c0_18 = arith.constant 0 : index
    %c0_19 = arith.constant 0 : index
    %21 = vector.load %arg9[%c0_18, %c0_19] : memref<1x3xf32, #tpu.memory_space<vmem>>, vector<1x3xf32>
    %22 = vector.broadcast %21 : vector<1x3xf32> to vector<8x3xf32>
    %23 = arith.addf %20, %22 : vector<8x3xf32>
    %c0_20 = arith.constant 0 : index
    %c0_21 = arith.constant 0 : index
    %24 = vector.load %arg10[%c0_20, %c0_21] : memref<8x3xf32, #tpu.memory_space<vmem>>, vector<8x3xf32>
    tpu.vector_store %arg10[%c0_20, %c0_21], %23 {strides = array<i32>} : memref<8x3xf32, #tpu.memory_space<vmem>>, vector<8x3xf32>,
    return
  }
  func.func @transform_0(%arg0: i32) -> (i32, i32) {
    %c0_i32 = arith.constant 0 : i32
    %c0_i32_0 = arith.constant 0 : i32
    return %arg0, %c0_i32 : i32, i32
  }
  func.func @transform_1(%arg0: i32) -> (i32, i32) {
    %c0_i32 = arith.constant 0 : i32
    %c0_i32_0 = arith.constant 0 : i32
    %c0_i32_1 = arith.constant 0 : i32
    return %c0_i32, %c0_i32_0 : i32, i32
  }
  func.func @transform_2(%arg0: i32) -> (i32, i32) {
    %c0_i32 = arith.constant 0 : i32
    %c0_i32_0 = arith.constant 0 : i32
    %c0_i32_1 = arith.constant 0 : i32
    return %c0_i32, %c0_i32_0 : i32, i32
  }
  func.func @transform_3(%arg0: i32) -> (i32, i32) {
    %c0_i32 = arith.constant 0 : i32
    %c0_i32_0 = arith.constant 0 : i32
    %c0_i32_1 = arith.constant 0 : i32
    return %c0_i32, %c0_i32_0 : i32, i32
  }
  func.func @transform_4(%arg0: i32) -> (i32, i32) {
    %c0_i32 = arith.constant 0 : i32
    %c0_i32_0 = arith.constant 0 : i32
    %c0_i32_1 = arith.constant 0 : i32
    return %c0_i32, %c0_i32_0 : i32, i32
  }
  func.func @transform_5(%arg0: i32) -> (i32, i32) {
    %c0_i32 = arith.constant 0 : i32
    %c0_i32_0 = arith.constant 0 : i32
    %c0_i32_1 = arith.constant 0 : i32
    return %c0_i32, %c0_i32_0 : i32, i32
  }
  func.func @transform_6(%arg0: i32) -> (i32, i32) {
    %c0_i32 = arith.constant 0 : i32
    %c0_i32_0 = arith.constant 0 : i32
    %c0_i32_1 = arith.constant 0 : i32
    return %c0_i32, %c0_i32_0 : i32, i32
  }
  func.func @transform_7(%arg0: i32) -> (i32, i32) {
    %c0_i32 = arith.constant 0 : i32
    %c0_i32_0 = arith.constant 0 : i32
    %c0_i32_1 = arith.constant 0 : i32
    return %c0_i32, %c0_i32_0 : i32, i32
  }
  func.func @transform_8(%arg0: i32) -> (i32, i32) {
    %c0_i32 = arith.constant 0 : i32
    %c0_i32_0 = arith.constant 0 : i32
    %c0_i32_1 = arith.constant 0 : i32
    return %c0_i32, %c0_i32_0 : i32, i32
  }
  func.func @transform_9(%arg0: i32) -> (i32, i32) {
    %c0_i32 = arith.constant 0 : i32
    %c0_i32_0 = arith.constant 0 : i32
    return %arg0, %c0_i32 : i32, i32
  }
}

</mosaic_0001>

<bundles_post_ra>
// kernel: tpu_custom_call.1
= control target key start
LH: loop header
LB: loop body
LE: loop exit
PB: predicated region body
PF: predicated region fallthrough
CT: control target
= control target key end

     0   :  { %vm42_vm0 = vcmask 1043456   ;;  %vm38_vm1 = vcmask 31744   ;;  %vm79_vm2 = vcmask 523264   ;;  %vm180_vm3 = vcmask 23552   ;;  %s369_s1 = inlined_call_operand.vmem [shape: f32[4,64], index: 1, kind: input, shape index: {}]   ;;  %s370_s0 = inlined_call_operand.vmem [shape: f32[8,4], index: 0, kind: input, shape index: {}]   ;;  %s371_s3 = inlined_call_operand.vmem [shape: f32[64,64], index: 3, kind: input, shape index: {}]   ;;  %s372_s2 = inlined_call_operand.vmem [shape: f32[1,64], index: 2, kind: input, shape index: {}]   ;;  %s373_s4 = inlined_call_operand.vmem [shape: f32[1,64], index: 4, kind: input, shape index: {}]   ;;  %s374_s5 = inlined_call_operand.vmem [shape: f32[64,128], index: 5, kind: input, shape index: {}]   ;;  %s375_s6 = inlined_call_operand.vmem [shape: f32[1,128], index: 6, kind: input, shape index: {}]   ;;  %s376_s7 = inlined_call_operand.vmem [shape: f32[128,3], index: 7, kind: input, shape index: {}]   ;;  %s377_s8 = inlined_call_operand.vmem [shape: f32[1,3], index: 8, kind: input, shape index: {}]   ;;  %s378_s9 = inlined_call_operand.vmem [shape: f32[8,3], index: 9, kind: output, shape index: {}]  }
   0x1   :  { %v33_v0 = vld [vmem:[%s369_s1] sm:$0xf]  ;;  %v74_v2 = vld [vmem:[%s371_s3 + $0x38] sm:$0xff]  ;;  %v73_v3 = vld [vmem:[%s371_s3 + $0x30] sm:$0xff] }
   0x2   :  { %v32_v1 = vld [vmem:[%s370_s0] sm:$0xff]  ;;  %186 = vmatpush.msk.msra.mxu0 %vm42_vm0, %v33_v0  ;;  %91 = vmatpush.msra.mxu1 %v74_v2  ;;  %v72_v4 = vld [vmem:[%s371_s3 + $0x28] sm:$0xff]  ;;  %v70_v6 = vld [vmem:[%s371_s3 + $0x18] sm:$0xff] }
   0x3   :  { %187 = vmatmul.msk.f32.vlgmr.msra.gmra.mxu0 %vm38_vm1, %v32_v1  ;;  %v71_v5 = vld [vmem:[%s371_s3 + $0x20] sm:$0xff]  ;;  %v69_v7 = vld [vmem:[%s371_s3 + $0x10] sm:$0xff]  ;;  %v68_v8 = vld [vmem:[%s371_s3 + $0x8] sm:$0xff] }
   0x4   :  { %92 = vmatpush.msra.mxu1 %v73_v3  ;;  %v67_v9 = vld [vmem:[%s371_s3] sm:$0xff]  ;;  %v111_v10 = vld [vmem:[%s374_s5 + $0x38] sm:$0xff]  ;;  %v110_v11 = vld [vmem:[%s374_s5 + $0x30] sm:$0xff] }
   0x5   :  { %127 = vmatpush.msra.mxu2 %v111_v10  ;;  %v109_v12 = vld [vmem:[%s374_s5 + $0x28] sm:$0xff]  ;;  %v190_v13 = vld [vmem:[%s372_s2] ss:$0 sm:$0xff]  ;;  %v107_v18 = vld [vmem:[%s374_s5 + $0x18] sm:$0xff] }
   0x6   :  { %93 = vmatpush.msra.mxu1 %v72_v4  ;;  %v108_v17 = vld [vmem:[%s374_s5 + $0x20] sm:$0xff]  ;;  %v106_v19 = vld [vmem:[%s374_s5 + $0x10] sm:$0xff]  ;;  %v105_v20 = vld [vmem:[%s374_s5 + $0x8] sm:$0xff] }
   0x7   :  { %128 = vmatpush.msra.mxu2 %v110_v11  ;;  %v104_v21 = vld [vmem:[%s374_s5] sm:$0xff]  ;;  %v155_v22 = vld [vmem:[%s376_s7 + $0x78] sm:$0xff]  ;;  %v154_v23 = vld [vmem:[%s376_s7 + $0x70] sm:$0xff] }
   0x8   :  { %94 = vmatpush.msra.mxu1 %v71_v5  ;;  %160 = vmatpush.msra.mxu3 %v155_v22  ;;  %v153_v24 = vld [vmem:[%s376_s7 + $0x68] sm:$0xff]  ;;  %v152_v25 = vld [vmem:[%s376_s7 + $0x60] sm:$0xff]  ;;  %v151_v26 = vld [vmem:[%s376_s7 + $0x58] sm:$0xff] }
   0x9   :  { %129 = vmatpush.msra.mxu2 %v109_v12  ;;  %v150_v27 = vld [vmem:[%s376_s7 + $0x50] sm:$0xff]  ;;  %v149_v28 = vld [vmem:[%s376_s7 + $0x48] sm:$0xff]  ;;  %v148_v29 = vld [vmem:[%s376_s7 + $0x40] sm:$0xff] }
   0xa   :  { %95 = vmatpush.msra.mxu1 %v70_v6  ;;  %161 = vmatpush.msra.mxu3 %v154_v23  ;;  %v147_v30 = vld [vmem:[%s376_s7 + $0x38] sm:$0xff]  ;;  %v146_v31 = vld [vmem:[%s376_s7 + $0x30] sm:$0xff]  ;;  %v145_v32 = vld [vmem:[%s376_s7 + $0x28] sm:$0xff] }
   0xb   :  { %130 = vmatpush.msra.mxu2 %v108_v17  ;;  %v191_v33 = vld [vmem:[%s373_s4] ss:$0 sm:$0xff]  ;;  %v143_v38 = vld [vmem:[%s376_s7 + $0x18] sm:$0xff]  ;;  %v142_v39 = vld [vmem:[%s376_s7 + $0x10] sm:$0xff] }
   0xc   :  { %96 = vmatpush.msra.mxu1 %v69_v7  ;;  %162 = vmatpush.msra.mxu3 %v153_v24  ;;  %v144_v37 = vld [vmem:[%s376_s7 + $0x20] sm:$0xff]  ;;  %v141_v40 = vld [vmem:[%s376_s7 + $0x8] sm:$0xff] }
   0xd   :  { %131 = vmatpush.msra.mxu2 %v107_v18  ;;  %v140_v41 = vld [vmem:[%s376_s7] sm:$0xff] }
   0xe   :  { %97 = vmatpush.msra.mxu1 %v68_v8  ;;  %163 = vmatpush.msra.mxu3 %v152_v25  ;;  %v192_v42 = vld [vmem:[%s375_s6] ss:$0 sm:$0xff] }
   0xf   :  { %132 = vmatpush.msra.mxu2 %v106_v19  ;;  %v193_v46 = vld [vmem:[%s377_s8] ss:$0 sm:$0xff] }
  0x10   :  { %98 = vmatpush.msra.mxu1 %v67_v9  ;;  %164 = vmatpush.msra.mxu3 %v151_v26 }
  0x11   :  { %133 = vmatpush.msra.mxu2 %v105_v20 }
  0x12   :  { %165 = vmatpush.msra.mxu3 %v150_v27 }
  0x13   :  { %134 = vmatpush.msra.mxu2 %v104_v21 }
  0x14   :  { %166 = vmatpush.msra.mxu3 %v149_v28 }
  0x16   :  { %167 = vmatpush.msra.mxu3 %v148_v29 }
  0x18   :  { %168 = vmatpush.msra.mxu3 %v147_v30 }
  0x1a   :  { %169 = vmatpush.msra.mxu3 %v146_v31 }
  0x1c   :  { %170 = vmatpush.msra.mxu3 %v145_v32 }
  0x1e   :  { %171 = vmatpush.msra.mxu3 %v144_v37 }
  0x20   :  { %172 = vmatpush.msra.mxu3 %v143_v38 }
  0x22   :  { %173 = vmatpush.msra.mxu3 %v142_v39 }
  0x24   :  { %174 = vmatpush.msra.mxu3 %v141_v40 }
  0x26   :  { %175 = vmatpush.msra.mxu3 %v140_v41 }
  0x80   :  { %v63_v14 = vpop.f32.mrf.mxu0 }
  0x81   :  { %v64_v15 = vadd.f32 %v190_v13, %v63_v14 }
  0x83   :  { %194 = vtanh.f32 %v64_v15 }
  0x89   :  { %v195_v16 = vpop.eup %194 }
  0x8a   :  { %188 = vmatmul.msk.f32.vlgmr.msra.gmra.mxu1 %vm79_vm2, %v195_v16 }
 0x107   :  { %v100_v34 = vpop.f32.mrf.mxu1 }
 0x108   :  { %v101_v35 = vadd.f32 %v191_v33, %v100_v34 }
 0x10a   :  { %196 = vtanh.f32 %v101_v35 }
 0x110   :  { %v197_v36 = vpop.eup %196 }
 0x111   :  { %189 = vmatmul.msk.f32.vlgmr.msra.gmra.mxu2 %vm79_vm2, %v197_v36 }
 0x194   :  { %v136_v43 = vpop.f32.mrf.mxu2 }
 0x195   :  { %v137_v44 = vadd.f32 %v192_v42, %v136_v43 }
 0x197   :  { %198 = vtanh.f32 %v137_v44 }
 0x19d   :  { %v199_v45 = vpop.eup %198 }
 0x19e   :  { %176 = vmatmul.f32.vlgmr.msra.gmra.mxu3 %v199_v45 }
 0x221   :  { %v177_v47 = vpop.f32.mrf.mxu3 }
 0x222   :  { %v178_v48 = vadd.f32 %v193_v46, %v177_v47 }
 0x224   :  { %181 = vst.msk [vmem:[%s378_s9] sm:$0xff] %vm180_vm3, %v178_v48 }

</bundles_post_ra>
